<compile_context>
chip_gen: v7x
topology: tpu7x:2x2x1
jax: 0.10.0
libtpu: 0.0.40
codegen_flags: <defaults>
</compile_context>

<pallas_src>
import jax
import jax.numpy as jnp
from jax.experimental import pallas as pl
from jax.experimental.pallas import tpu as pltpu

_LANE = 128            # lane width / minimum batch tile
_TB_MAX = 32768        # max batch lanes per grid step (1 MiB f32 per operand block)
_SPLIT_LANES = 1024    # below this, use a single grid step (pure overhead otherwise)
_K_PAD = 8             # contraction dim padded 6 -> 8 (row 6 carries the bias ones)
_N_PAD = 8             # output feature dim padded 3 -> 8


def _round_up(x, m):
    return ((x + m - 1) // m) * m


def _linear_hardsigmoid_kernel(w_ref, x_ref, o_ref):
    # o_T = clip(W' @ x_T, 0, 1); hardsigmoid affine + bias already folded into W'/x_T.
    acc = jnp.dot(w_ref[...], x_ref[...], preferred_element_type=jnp.float32)
    o_ref[...] = jnp.clip(acc, 0.0, 1.0).astype(o_ref.dtype)


def linear_hardsigmoid(x, weight, bias):
    """x: (B, K) f32, weight: (N, K) f32 (PyTorch layout), bias: (N,) f32.

    Returns (B, N) f32 equal to clamp(x @ weight.T + bias + 3, 0, 6) / 6.
    """
    B, K = x.shape
    N, K2 = weight.shape
    assert K == K2
    assert K < _K_PAD and N <= _N_PAD  # need a spare contraction row for the bias fold

    # ---- batch tiling -------------------------------------------------------
    b_128 = _round_up(B, _LANE)
    if b_128 <= _SPLIT_LANES:
        # Small batch: a single grid step, no pipelining bookkeeping.
        grid_b = 1
        tb = b_128
    else:
        # Large batch: at least 2 parallel steps (both v7x TensorCores), tile
        # capped at _TB_MAX lanes; round per-step tile to the lane width so
        # padding waste stays bounded.
        grid_b = max(2, -(-b_128 // _TB_MAX))
        tb = _round_up(-(-b_128 // grid_b), _LANE)
    b_pad = tb * grid_b

    # ---- constant folding + layout plumbing (wrapper-side XLA ops) ----------
    # W' = W/6 with bias column:  W'[:, K] = (b + 3)/6.
    w_fold = (weight * (1.0 / 6.0)).astype(jnp.float32)
    b_fold = ((bias + 3.0) * (1.0 / 6.0)).astype(jnp.float32)
    w_pad = (jnp.zeros((_N_PAD, _K_PAD), jnp.float32)
             .at[:N, :K].set(w_fold)
             .at[:N, K].set(b_fold))

    # x -> x_T (K_PAD, B_pad), lane-dense in batch; row K is the bias "ones" row.
    x_t = (jnp.zeros((_K_PAD, b_pad), jnp.float32)
           .at[:K, :B].set(x.T)
           .at[K, :].set(1.0))

    out_t = pl.pallas_call(
        _linear_hardsigmoid_kernel,
        out_shape=jax.ShapeDtypeStruct((_N_PAD, b_pad), jnp.float32),
        grid=(grid_b,),
        in_specs=[
            pl.BlockSpec((_N_PAD, _K_PAD), lambda i: (0, 0)),   # W' (tiny, resident)
            pl.BlockSpec((_K_PAD, tb), lambda i: (0, i)),        # x_T batch tile
        ],
        out_specs=pl.BlockSpec((_N_PAD, tb), lambda i: (0, i)),  # o_T batch tile
        compiler_params=pltpu.CompilerParams(
            dimension_semantics=("parallel",),
            # ~4 MiB of double-buffered blocks at tb=32768; explicit limit keeps
            # headroom on v5e's 16 MiB default scoped VMEM if tiles are bumped.
            vmem_limit_bytes=32 * 1024 * 1024,
        ),
    )(w_pad, x_t)

    # Drop padding, return (B, N) to match the PyTorch module's interface.
    # (Padded columns of out_t hold clip(b', 0, 1), not zeros — never reuse them.)
    return out_t[:N, :B].T


if __name__ == "__main__":
    key = jax.random.PRNGKey(0)
    kx, kw, kb, kx2 = jax.random.split(key, 4)

    in_features, out_features, batch = 6, 3, 8

    # Deterministic Linear(6, 3) init (PyTorch-style uniform bound 1/sqrt(fan_in)).
    bound = 1.0 / jnp.sqrt(jnp.float32(in_features))
    weight = jax.random.uniform(kw, (out_features, in_features),
                                minval=-bound, maxval=bound, dtype=jnp.float32)
    bias = jax.random.uniform(kb, (out_features,),
                              minval=-bound, maxval=bound, dtype=jnp.float32)

    def ref_fn(xin):
        return jnp.clip(xin @ weight.T + bias + 3.0, 0.0, 6.0) / 6.0

    # Small-batch path (single grid step).
    x_small = jax.random.normal(kx, (batch, in_features), dtype=jnp.float32)
    out_small = linear_hardsigmoid(x_small, weight, bias)
    jax.block_until_ready(out_small)
    assert out_small.shape == (batch, out_features)
    assert jnp.allclose(out_small, ref_fn(x_small), atol=1e-5, rtol=1e-5)

    # Multi-step path (exercises grid_b >= 2 and batch padding).
    x_big = jax.random.normal(kx2, (1200, in_features), dtype=jnp.float32)
    out_big = linear_hardsigmoid(x_big, weight, bias)
    jax.block_until_ready(out_big)
    assert out_big.shape == (1200, out_features)
    assert jnp.allclose(out_big, ref_fn(x_big), atol=1e-5, rtol=1e-5)

    print("KERNEL_OK")
</pallas_src>

<mosaic_0001>
module attributes {stable_mosaic.version = 11 : i64} {
  func.func @_linear_hardsigmoid_kernel(%arg0: i32, %arg1: memref<8x8xf32, #tpu.memory_space<vmem>>, %arg2: memref<8x128xf32, #tpu.memory_space<vmem>>, %arg3: memref<8x128xf32, #tpu.memory_space<vmem>>) attributes {dimension_semantics = [#tpu.dimension_semantics<parallel>], iteration_bounds = array<i64: 1>, scalar_prefetch = 0 : i64, scratch_operands = 0 : i64, tpu.core_type = #tpu.core_type<tc>, window_params = [{pipeline_mode = #tpu.pipeline_mode<synchronous>, transform_indices = @transform_0, window_bounds = array<i64: 8, 8>}, {transform_indices = @transform_1, window_bounds = array<i64: 8, 128>}, {transform_indices = @transform_2, window_bounds = array<i64: 8, 128>}]} {
    %c0 = arith.constant 0 : index
    %c0_0 = arith.constant 0 : index
    %0 = vector.load %arg1[%c0, %c0_0] : memref<8x8xf32, #tpu.memory_space<vmem>>, vector<8x8xf32>
    %c0_1 = arith.constant 0 : index
    %c0_2 = arith.constant 0 : index
    %1 = vector.load %arg2[%c0_1, %c0_2] : memref<8x128xf32, #tpu.memory_space<vmem>>, vector<8x128xf32>
    %cst = arith.constant dense<0.000000e+00> : vector<8x128xf32>
    %2 = tpu.matmul %0, %1, %cst {dimension_numbers = #tpu.dot_dimension_numbers<[1], [0], [0], [1], [0, 0, 1, 1], [], []>} : vector<8x8xf32>, vector<8x128xf32>, vector<8x128xf32> -> vector<8x128xf32>
    %cst_3 = arith.constant 0.000000e+00 : f32
    %cst_4 = arith.constant 1.000000e+00 : f32
    %3 = vector.broadcast %cst_3 : f32 to vector<8x128xf32>
    %4 = arith.maximumf %3, %2 : vector<8x128xf32>
    %5 = vector.broadcast %cst_4 : f32 to vector<8x128xf32>
    %6 = arith.minimumf %5, %4 : vector<8x128xf32>
    %c0_5 = arith.constant 0 : index
    %c0_6 = arith.constant 0 : index
    %7 = vector.load %arg3[%c0_5, %c0_6] : memref<8x128xf32, #tpu.memory_space<vmem>>, vector<8x128xf32>
    tpu.vector_store %arg3[%c0_5, %c0_6], %6 {strides = array<i32>} : memref<8x128xf32, #tpu.memory_space<vmem>>, vector<8x128xf32>,
    return
  }
  func.func @transform_0(%arg0: i32) -> (i32, i32) {
    %c0_i32 = arith.constant 0 : i32
    %c0_i32_0 = arith.constant 0 : i32
    %c0_i32_1 = arith.constant 0 : i32
    return %c0_i32, %c0_i32_0 : i32, i32
  }
  func.func @transform_1(%arg0: i32) -> (i32, i32) {
    %c0_i32 = arith.constant 0 : i32
    %c0_i32_0 = arith.constant 0 : i32
    return %c0_i32, %arg0 : i32, i32
  }
  func.func @transform_2(%arg0: i32) -> (i32, i32) {
    %c0_i32 = arith.constant 0 : i32
    %c0_i32_0 = arith.constant 0 : i32
    return %c0_i32, %arg0 : i32, i32
  }
}

</mosaic_0001>

<bundles_post_ra>
// kernel: tpu_custom_call.1
= control target key start
LH: loop header
LB: loop body
LE: loop exit
PB: predicated region body
PF: predicated region fallthrough
CT: control target
= control target key end

     0   :  { %7 = vsyncpa [#allocation3], 0  ;;  %s272_s0 = inlined_call_operand.hbm [shape: f32[8,8], index: 0, kind: input, shape index: {}]   ;;  %s273_s1 = inlined_call_operand.hbm [shape: f32[8,128], index: 1, kind: input, shape index: {}]   ;;  %s274_s2 = inlined_call_operand.hbm [shape: f32[8,128], index: 2, kind: output, shape index: {}]  }
   0x1   :  { %8 = vsyncpa [#allocation6], 0 }
   0x2   :  { %9 = vsyncpa [#allocation4], 0  ;;  %s216_s9 = smov [#allocation2]   ;;  %s217_s11 = smov [#allocation5]  }
   0x3   :  { %s16_s10 = sshll.u32 %s216_s9, 4  ;;  %s26_s12 = sshll.u32 %s217_s11, 4  ;;  %s17_s10 = int_to_ptr.vmem [resolvable:$true] %s16_s10  ;;  %s27_s12 = int_to_ptr.vmem [resolvable:$true] %s26_s12 }
   0x4   :  { %s144_s15 = scalar_lea.hbm %s272_s0, 128 }
   0x5   :  { %p145_p0 = scmp.ne.s32.totalorder %s272_s0, %s144_s15  ;;  %p148_p1 = scmp.lt.u32.totalorder %s144_s15, %s272_s0 }
   0x7   :  { %p150_p2 = pnand %p148_p1, %p145_p0 }
   0x9   :  { %153 = shalt.err (!%p150_p2)
}
   0xa   :  { %s154_s20 = scalar_lea.vmem %s17_s10, 128  ;;  %p159_p4 = scmp.lt.s32.totalorder %s17_s10, %s17_s10 }
   0xb   :  { %p155_p3 = scmp.ne.s32.totalorder %s17_s10, %s154_s20  ;;  %p160_p5 = scmp.lt.s32.totalorder %s154_s20, %s154_s20 }
   0xd   :  { %p161_p6 = por %p160_p5, %p159_p4 }
   0xf   :  { %p162_p7 = pnand %p161_p6, %p155_p3 }
  0x11   :  { %165 = shalt.err (!%p162_p7)
}
  0x12   :  { %19 = dma.hbm_to_vmem [thread:$0]  %s272_s0, 128, %s17_s10, [#allocation3]  }
  0x13   :  { %s166_s25 = scalar_lea.hbm %s273_s1, 128 }
  0x14   :  { %p167_p8 = scmp.ne.s32.totalorder %s273_s1, %s166_s25  ;;  %p170_p9 = scmp.lt.u32.totalorder %s166_s25, %s273_s1 }
  0x16   :  { %p172_p10 = pnand %p170_p9, %p167_p8 }
  0x18   :  { %175 = shalt.err (!%p172_p10)
}
  0x19   :  { %s176_s30 = scalar_lea.vmem %s27_s12, 128  ;;  %p181_p12 = scmp.lt.s32.totalorder %s27_s12, %s27_s12 }
  0x1a   :  { %p177_p11 = scmp.ne.s32.totalorder %s27_s12, %s176_s30  ;;  %p182_p13 = scmp.lt.s32.totalorder %s176_s30, %s176_s30 }
  0x1c   :  { %p183_p0 = por %p182_p13, %p181_p12 }
  0x1e   :  { %p184_p1 = pnand %p183_p0, %p177_p11 }
  0x20   :  { %187 = shalt.err (!%p184_p1)
}
  0x21   :  { %29 = dma.hbm_to_vmem [thread:$0]  %s273_s1, 128, %s27_s12, [#allocation6]  }
  0x22   :  { %210 = dma.done.wait [#allocation3], 128  }
  0x23   :  { %211 = vsyncadd [#allocation3], 4294967168 }
  0x24   :  { %212 = dma.done.wait [#allocation6], 128  }
  0x25   :  { %213 = vsyncadd [#allocation6], 4294967168  ;;  %v218_v0 = vmov 0.0   ;;  %vm219_vm0 = vmmov 0   ;;  %vm38_vm1 = vcmask 64512   ;;  %v37_v1 = vld [vmem:[#allocation5] sm:$0xff] }
  0x26   :  { %134 = vmatprep.subr.mxu0 %v218_v0  ;;  %136 = vmatprep.mubr.msk.f32.mxu0 %vm219_vm0, %v218_v0  ;;  %v36_v2 = vld [vmem:[#allocation2] sm:$0xff]  ;;  %s220_s4 = smov [#allocation7]  }
  0x27   :  { %135 = vmatpush3.msra.mxu0 %v37_v1  ;;  %s121_s5 = sshll.u32 %s220_s4, 4  ;;  %s122_s5 = int_to_ptr.vmem [resolvable:$true] %s121_s5 }
  0x28   :  { %137 = vmatmul.mubr.msk.f32.vlgmr.msra.gmra.mrb[0].mxu0 %vm38_vm1, %v36_v2  ;;  %s188_s1 = scalar_lea.vmem %s122_s5, 128  ;;  %p193_p3 = scmp.lt.s32.totalorder %s122_s5, %s122_s5 }
  0x29   :  { %p189_p2 = scmp.ne.s32.totalorder %s122_s5, %s188_s1  ;;  %p194_p4 = scmp.lt.s32.totalorder %s188_s1, %s188_s1 }
  0x2b   :  { %p195_p5 = por %p194_p4, %p193_p3 }
  0x2d   :  { %p196_p6 = pnand %p195_p5, %p189_p2 }
  0xfb   :  { %v108_v3 = vpop.f32.mrb[0].mxu0 }
  0xfc   :  { %v112_v4 = vmax.f32 %v108_v3, 0.0  ;;  %v138_v5 = vpop.f32.mrb[1].mxu0 }
  0xfe   :  { %v113_v6 = vmin.f32 %v112_v4, 1.0 }
 0x100   :  { %114 = vst [vmem:[#allocation7] sm:$0xff] %v113_v6 }
 0x101   :  { %199 = shalt.err (!%p196_p6)
}
 0x102   :  { %s200_s8 = scalar_lea.hbm %s274_s2, 128 }
 0x103   :  { %p201_p7 = scmp.ne.s32.totalorder %s274_s2, %s200_s8  ;;  %p204_p8 = scmp.lt.u32.totalorder %s200_s8, %s274_s2 }
 0x105   :  { %p206_p9 = pnand %p204_p8, %p201_p7 }
 0x107   :  { %209 = shalt.err (!%p206_p9)
}
 0x108   :  { %124 = dma.vmem_to_hbm [thread:$0]  %s122_s5, 128, %s274_s2, [#allocation4]  }
 0x109   :  { %214 = dma.done.wait [#allocation4], 128  }
 0x10a   :  { %215 = vsyncadd [#allocation4], 4294967168 }
 0x10b   :  { %128 = vsyncpa [#allocation3], 1 }
 0x10c   :  { %129 = vsyncpa [#allocation6], 1 }
 0x10d   :  { %130 = vsyncpa [#allocation4], 1 }

</bundles_post_ra>
